<compile_context>
chip_gen: v7x
topology: tpu7x:2x2x1
jax: 0.10.0
libtpu: 0.0.40
codegen_flags: <defaults>
</compile_context>

<pallas_src>
import jax
import jax.numpy as jnp
from jax.experimental import pallas as pl
from jax.experimental.pallas import tpu as pltpu

LANES = 128           # vreg lane width: last dim of every block
MAX_TILE_ROWS = 2048  # 2048*128*4B = 1 MiB per buffer; double-buffered in+out = 4 MiB


def linear_kernel(w_ref, b_ref, x_ref, o_ref):
    # w_ref, b_ref: (1,) f32 scalars in SMEM (loop-invariant; no vector-load slot used,
    # no padded (8,128) VMEM tiles, no per-step scalar DMAs).
    # x_ref / o_ref: (tile_rows, 128) lane-dense VMEM tiles -> unmasked full-vreg vld/vst.
    # Linear(1,1) is an elementwise FMA: y = x * w + b.
    o_ref[...] = x_ref[...] * w_ref[0] + b_ref[0]


def _round_up(n, m):
    return ((n + m - 1) // m) * m


@jax.jit
def linear_forward(x, weight, bias):
    """x: [B, 1] f32, weight: [1, 1] f32 (out_features, in_features), bias: [1] f32 -> [B, 1]."""
    B = x.shape[0]
    dtype = x.dtype

    # Lane-dense layout: view the batch as a (rows, 128) slab so every load/store
    # uses all 128 lanes instead of a masked 1-of-128 column.
    rows = max(pl.cdiv(B, LANES), 1)

    if rows <= 8:
        # Single full-array block (block shape == array shape is exempt from the
        # (8,128) divisibility rule): no alignment padding, grid of 1.
        tile_rows = rows
        rows_padded = rows
    else:
        # >= 2 grid steps so the "parallel" axis shards across both TensorCores on
        # v7x (megacore); tiles capped at MAX_TILE_ROWS and 8-sublane aligned. The
        # step count is chosen so the padded tail is at most ~8 rows per step
        # instead of up to a whole tile.
        n_steps = max(2, pl.cdiv(rows, MAX_TILE_ROWS))
        tile_rows = _round_up(pl.cdiv(rows, n_steps), 8)
        rows_padded = _round_up(rows, tile_rows)

    total = rows_padded * LANES

    # Skip the pad copy entirely in the aligned common case; reshape alone is free in XLA.
    x_flat = x.reshape(-1)
    if total != B:
        x_flat = jnp.pad(x_flat, (0, total - B))
    x_slab = x_flat.reshape(rows_padded, LANES)

    # TODO(synk): this scalar-FMA path hard-codes Linear(1,1); in/out features > 1
    # would need a real MXU matmul tile instead.
    w = weight.reshape(1).astype(dtype)
    b = bias.reshape(1).astype(dtype)

    y_slab = pl.pallas_call(
        linear_kernel,
        out_shape=jax.ShapeDtypeStruct((rows_padded, LANES), dtype),
        grid=(rows_padded // tile_rows,),
        in_specs=[
            pl.BlockSpec(memory_space=pltpu.MemorySpace.SMEM),    # weight scalar in SMEM
            pl.BlockSpec(memory_space=pltpu.MemorySpace.SMEM),    # bias scalar in SMEM
            pl.BlockSpec((tile_rows, LANES), lambda i: (i, 0)),   # x tile
        ],
        out_specs=pl.BlockSpec((tile_rows, LANES), lambda i: (i, 0)),
        compiler_params=pltpu.CompilerParams(
            # Batch tiles are independent -> shard across TensorCores (megacore / v7x).
            dimension_semantics=("parallel",),
        ),
    )(w, b, x_slab)

    if total == B:
        # Pure metadata reshape; no extra HBM traffic around the kernel.
        return y_slab.reshape(B, 1)
    # Padded path: drop the tail and restore the [B, 1] PyTorch layout.
    return y_slab.reshape(-1)[:B].reshape(B, 1)


if __name__ == "__main__":
    key = jax.random.PRNGKey(0)
    kx, kw, kb = jax.random.split(key, 3)

    # nn.Linear(1, 1) init: uniform(-1, 1) since in_features == 1
    weight = jax.random.uniform(kw, (1, 1), dtype=jnp.float32, minval=-1.0, maxval=1.0)
    bias = jax.random.uniform(kb, (1,), dtype=jnp.float32, minval=-1.0, maxval=1.0)

    # 300: exercises the pad + slice tail path; 1024: aligned zero-copy path (no pad/slice).
    for B in (300, 1024):
        x = jax.random.normal(kx, (B, 1), dtype=jnp.float32)
        y = linear_forward(x, weight, bias)
        jax.block_until_ready(y)

        y_ref = x @ weight.T + bias
        assert y.shape == (B, 1)
        assert jnp.allclose(y, y_ref, atol=1e-6), (B, y, y_ref)

    print("KERNEL_OK")
</pallas_src>

<mosaic_0001>
module attributes {stable_mosaic.version = 11 : i64} {
  func.func @linear_kernel(%arg0: i32, %arg1: memref<1xf32, #tpu.memory_space<smem>>, %arg2: memref<1xf32, #tpu.memory_space<smem>>, %arg3: memref<3x128xf32, #tpu.memory_space<vmem>>, %arg4: memref<3x128xf32, #tpu.memory_space<vmem>>) attributes {dimension_semantics = [#tpu.dimension_semantics<parallel>], iteration_bounds = array<i64: 1>, scalar_prefetch = 0 : i64, scratch_operands = 0 : i64, tpu.core_type = #tpu.core_type<tc>, window_params = [{transform_indices = @transform_0, window_bounds = array<i64: 1>}, {transform_indices = @transform_1, window_bounds = array<i64: 1>}, {transform_indices = @transform_2, window_bounds = array<i64: 3, 128>}, {transform_indices = @transform_3, window_bounds = array<i64: 3, 128>}]} {
    %c0 = arith.constant 0 : index
    %c0_0 = arith.constant 0 : index
    %0 = vector.load %arg3[%c0, %c0_0] : memref<3x128xf32, #tpu.memory_space<vmem>>, vector<3x128xf32>
    %c0_1 = arith.constant 0 : index
    %1 = memref.load %arg1[%c0_1] : memref<1xf32, #tpu.memory_space<smem>>
    %2 = vector.broadcast %1 : f32 to vector<3x128xf32>
    %3 = arith.mulf %0, %2 : vector<3x128xf32>
    %c0_2 = arith.constant 0 : index
    %4 = memref.load %arg2[%c0_2] : memref<1xf32, #tpu.memory_space<smem>>
    %5 = vector.broadcast %4 : f32 to vector<3x128xf32>
    %6 = arith.addf %3, %5 : vector<3x128xf32>
    %c0_3 = arith.constant 0 : index
    %c0_4 = arith.constant 0 : index
    %7 = vector.load %arg4[%c0_3, %c0_4] : memref<3x128xf32, #tpu.memory_space<vmem>>, vector<3x128xf32>
    tpu.vector_store %arg4[%c0_3, %c0_4], %6 {strides = array<i32>} : memref<3x128xf32, #tpu.memory_space<vmem>>, vector<3x128xf32>,
    return
  }
  func.func @transform_0(%arg0: i32) -> i32 {
    %c0_i32 = arith.constant 0 : i32
    %c0_i32_0 = arith.constant 0 : i32
    return %c0_i32 : i32
  }
  func.func @transform_1(%arg0: i32) -> i32 {
    %c0_i32 = arith.constant 0 : i32
    %c0_i32_0 = arith.constant 0 : i32
    return %c0_i32 : i32
  }
  func.func @transform_2(%arg0: i32) -> (i32, i32) {
    %c0_i32 = arith.constant 0 : i32
    %c0_i32_0 = arith.constant 0 : i32
    return %arg0, %c0_i32 : i32, i32
  }
  func.func @transform_3(%arg0: i32) -> (i32, i32) {
    %c0_i32 = arith.constant 0 : i32
    %c0_i32_0 = arith.constant 0 : i32
    return %arg0, %c0_i32 : i32, i32
  }
}

</mosaic_0001>

<bundles_post_ra>
// kernel: linear_forward.1
= control target key start
LH: loop header
LB: loop body
LE: loop exit
PB: predicated region body
PF: predicated region fallthrough
CT: control target
= control target key end

     0   :  { %s60_s0 = inlined_call_operand.<no memory space> [shape: f32[1], index: 0, kind: input, shape index: {}]   ;;  %s61_s1 = inlined_call_operand.<no memory space> [shape: f32[1], index: 1, kind: input, shape index: {}]   ;;  %s62_s2 = inlined_call_operand.vmem [shape: f32[3,128], index: 2, kind: input, shape index: {}]   ;;  %s63_s3 = inlined_call_operand.vmem [shape: f32[3,128], index: 3, kind: output, shape index: {}]  }
   0x1   :  { %v16_v0 = vld [vmem:[%s62_s2] sm:$0x7]  ;;  %v18_v1 = vstv %s60_s0  ;;  %v21_v2 = vstv %s61_s1 }
   0x2   :  { %v19_v3 = vmul.f32 %v18_v1, %v16_v0 }
   0x4   :  { %v22_v4 = vadd.f32 %v21_v2, %v19_v3 }
   0x6   :  { %23 = vst [vmem:[%s63_s3] sm:$0x7] %v22_v4 }

</bundles_post_ra>
